<compile_context>
chip_gen: v7x
topology: tpu7x:2x2x1
jax: 0.10.0
libtpu: 0.0.40
codegen_flags: <defaults>
</compile_context>

<pallas_src>
import functools

import jax
import jax.numpy as jnp
from jax.experimental import pallas as pl
from jax.experimental.pallas import tpu as pltpu


def _dice_kernel(x_ref, t_ref, out_ref, acc_st, acc_t, acc_ss, *,
                 n_classes, do_softmax, mask_invalid, smooth):
    """Grid: (batch, spatial tiles). Both axes are reduction axes."""
    n = pl.program_id(0)
    i = pl.program_id(1)
    is_first = jnp.logical_and(n == 0, i == 0)
    is_last = jnp.logical_and(n == pl.num_programs(0) - 1,
                              i == pl.num_programs(1) - 1)

    @pl.when(is_first)
    def _init():
        acc_st[...] = jnp.zeros_like(acc_st)
        acc_t[...] = jnp.zeros_like(acc_t)
        acc_ss[...] = jnp.zeros_like(acc_ss)

    x = x_ref[...].astype(jnp.float32)          # (C, TM)
    t = t_ref[...]                              # (1, TM) int32 labels

    if do_softmax:
        m = jnp.max(x, axis=0, keepdims=True)
        e = jnp.exp(x - m)
        s = jnp.sum(e, axis=0, keepdims=True)
        x = e * pl.reciprocal(s)                # exact reciprocal on the EUP

    if mask_invalid:
        # Padded columns carry label -1: zero their score so intersect and
        # z_sum stay exact (one-hot is already all-zero for label -1).
        x = x * (t >= 0).astype(jnp.float32)

    cls = jax.lax.broadcasted_iota(jnp.int32, x.shape, 0)   # (C, TM)
    onehot = (cls == t).astype(jnp.float32)                 # (C, TM)

    acc_st[...] += x * onehot      # per-class, per-lane partial intersect
    acc_t[...] += onehot           # per-class, per-lane partial y_sum
    acc_ss[...] += x * x           # per-class, per-lane partial z_sum

    @pl.when(is_last)
    def _finalize():
        intersect = jnp.sum(acc_st[...], axis=1, keepdims=True)   # (C, 1)
        y_sum = jnp.sum(acc_t[...], axis=1, keepdims=True)        # (C, 1)
        z_sum = jnp.sum(acc_ss[...], axis=1, keepdims=True)       # (C, 1)
        dice = 1.0 - (2.0 * intersect + smooth) / (z_sum + y_sum + smooth)
        out_ref[...] = dice


def _round_up(a, b):
    return (a + b - 1) // b * b


@functools.partial(
    jax.jit, static_argnames=("n_classes", "weight", "softmax", "tile_m"))
def dice_loss(inputs, target, n_classes, weight=None, softmax=False,
              tile_m=8192):
    """Pallas DiceLoss forward.

    inputs: (N, C, H, W) float scores, target: (N, H, W) int class labels.
    """
    N, C, H, W = inputs.shape
    assert C == n_classes, "channel dim must equal n_classes"
    if weight is None:
        weight = (1.0,) * n_classes
    weight = tuple(float(w) for w in weight)

    HW = H * W
    # Lane tile: as large as requested, but never larger than the (128-rounded)
    # spatial extent, and always a multiple of 128.
    TM = min(_round_up(int(tile_m), 128), _round_up(HW, 128))
    HW_pad = _round_up(HW, TM)
    pad = HW_pad - HW

    # Free reshapes (NCHW is contiguous) -- no HBM transpose.
    x = inputs.reshape(N, C, HW).astype(jnp.float32)
    t = target.reshape(N, 1, HW).astype(jnp.int32)
    if pad:
        x = jnp.pad(x, ((0, 0), (0, 0), (0, pad)))
        t = jnp.pad(t, ((0, 0), (0, 0), (0, pad)), constant_values=-1)

    kernel = functools.partial(
        _dice_kernel,
        n_classes=n_classes,
        do_softmax=bool(softmax),
        mask_invalid=bool(pad),
        smooth=1e-5,
    )

    dice = pl.pallas_call(
        kernel,
        out_shape=jax.ShapeDtypeStruct((n_classes, 1), jnp.float32),
        grid_spec=pltpu.PrefetchScalarGridSpec(
            num_scalar_prefetch=0,
            grid=(N, HW_pad // TM),
            in_specs=[
                # batch dim squeezed out of the kernel view
                pl.BlockSpec((None, C, TM), lambda n, i: (n, 0, i)),
                pl.BlockSpec((None, 1, TM), lambda n, i: (n, 0, i)),
            ],
            out_specs=pl.BlockSpec((n_classes, 1), lambda n, i: (0, 0)),
            scratch_shapes=[
                pltpu.VMEM((n_classes, TM), jnp.float32),   # sum(score*target)
                pltpu.VMEM((n_classes, TM), jnp.float32),   # sum(target)
                pltpu.VMEM((n_classes, TM), jnp.float32),   # sum(score*score)
            ],
        ),
        compiler_params=pltpu.CompilerParams(
            dimension_semantics=("arbitrary", "arbitrary")),
    )(x, t)

    # Tiny weighted mean over classes -- done outside the kernel so the weight
    # vector is never captured as an in-kernel constant.
    w = jnp.asarray(weight, jnp.float32).reshape(n_classes, 1)
    return jnp.sum(dice * w) / n_classes


def dice_loss_ref(inputs, target, n_classes, weight=None, softmax=False):
    """Pure-JAX reference matching the PyTorch module semantics."""
    if softmax:
        inputs = jax.nn.softmax(inputs, axis=1)
    onehot = jax.nn.one_hot(target, n_classes, axis=1, dtype=jnp.float32)
    if weight is None:
        weight = [1.0] * n_classes
    smooth = 1e-5
    loss = 0.0
    for i in range(n_classes):
        score = inputs[:, i].astype(jnp.float32)
        tgt = onehot[:, i]
        intersect = jnp.sum(score * tgt)
        y_sum = jnp.sum(tgt * tgt)
        z_sum = jnp.sum(score * score)
        dice = 1.0 - (2.0 * intersect + smooth) / (z_sum + y_sum + smooth)
        loss = loss + dice * weight[i]
    return loss / n_classes


if __name__ == "__main__":
    key = jax.random.PRNGKey(0)
    k1, k2 = jax.random.split(key)

    N, C, H, W = 2, 4, 16, 16
    inputs = jax.random.normal(k1, (N, C, H, W), dtype=jnp.float32)
    target = jax.random.randint(k2, (N, H, W), 0, C, dtype=jnp.int32)

    # softmax=False path (PyTorch default)
    out0 = dice_loss(inputs, target, n_classes=C, softmax=False)
    jax.block_until_ready(out0)
    ref0 = dice_loss_ref(inputs, target, n_classes=C, softmax=False)

    # softmax=True path (softmax computed inside the kernel)
    out1 = dice_loss(inputs, target, n_classes=C, softmax=True)
    jax.block_until_ready(out1)
    ref1 = dice_loss_ref(inputs, target, n_classes=C, softmax=True)

    # non-128-multiple spatial size exercises the padding/masking path
    H2, W2 = 9, 13
    inp2 = jax.random.normal(k1, (N, C, H2, W2), dtype=jnp.float32)
    tgt2 = jax.random.randint(k2, (N, H2, W2), 0, C, dtype=jnp.int32)
    out2 = dice_loss(inp2, tgt2, n_classes=C, softmax=True)
    jax.block_until_ready(out2)
    ref2 = dice_loss_ref(inp2, tgt2, n_classes=C, softmax=True)

    # weighted path
    wts = (0.5, 1.0, 2.0, 0.25)
    out3 = dice_loss(inputs, target, n_classes=C, weight=wts, softmax=True)
    jax.block_until_ready(out3)
    ref3 = dice_loss_ref(inputs, target, n_classes=C, weight=list(wts),
                         softmax=True)

    assert jnp.allclose(out0, ref0, rtol=1e-5, atol=1e-6), (out0, ref0)
    assert jnp.allclose(out1, ref1, rtol=1e-5, atol=1e-6), (out1, ref1)
    assert jnp.allclose(out2, ref2, rtol=1e-5, atol=1e-6), (out2, ref2)
    assert jnp.allclose(out3, ref3, rtol=1e-5, atol=1e-6), (out3, ref3)

    print("KERNEL_OK")
</pallas_src>

<mosaic_0001>
module attributes {stable_mosaic.version = 11 : i64} {
  func.func @_dice_kernel(%arg0: i32, %arg1: i32, %arg2: memref<1x4x256xf32, #tpu.memory_space<vmem>>, %arg3: memref<1x1x256xi32, #tpu.memory_space<vmem>>, %arg4: memref<4x1xf32, #tpu.memory_space<vmem>>, %arg5: memref<4x256xf32, #tpu.memory_space<vmem>>, %arg6: memref<4x256xf32, #tpu.memory_space<vmem>>, %arg7: memref<4x256xf32, #tpu.memory_space<vmem>>) attributes {dimension_semantics = [#tpu.dimension_semantics<arbitrary>, #tpu.dimension_semantics<arbitrary>], iteration_bounds = array<i64: 2, 1>, scalar_prefetch = 0 : i64, scratch_operands = 3 : i64, tpu.core_type = #tpu.core_type<tc>, window_params = [{transform_indices = @transform_0, window_bounds = array<i64: 1, 4, 256>}, {transform_indices = @transform_1, window_bounds = array<i64: 1, 1, 256>}, {pipeline_mode = #tpu.pipeline_mode<synchronous>, transform_indices = @transform_2, window_bounds = array<i64: 4, 1>}]} {
    %c0_i32 = arith.constant 0 : i32
    %0 = arith.cmpi eq, %arg0, %c0_i32 : i32
    %c0_i32_0 = arith.constant 0 : i32
    %1 = arith.cmpi eq, %arg1, %c0_i32_0 : i32
    %2 = arith.andi %0, %1 : i1
    %c1_i32 = arith.constant 1 : i32
    %3 = arith.cmpi eq, %arg0, %c1_i32 : i32
    %c0_i32_1 = arith.constant 0 : i32
    %4 = arith.cmpi eq, %arg1, %c0_i32_1 : i32
    %5 = arith.andi %3, %4 : i1
    %6 = arith.extui %2 : i1 to i32
    %c0_i32_2 = arith.constant 0 : i32
    %7 = arith.cmpi ne, %6, %c0_i32_2 : i32
    scf.if %7 {
      %cst = arith.constant 0.000000e+00 : f32
      %30 = vector.broadcast %cst : f32 to vector<4x256xf32>
      %c0_21 = arith.constant 0 : index
      %c0_22 = arith.constant 0 : index
      %31 = vector.load %arg5[%c0_21, %c0_22] : memref<4x256xf32, #tpu.memory_space<vmem>>, vector<4x256xf32>
      tpu.vector_store %arg5[%c0_21, %c0_22], %30 {strides = array<i32>} : memref<4x256xf32, #tpu.memory_space<vmem>>, vector<4x256xf32>,
      %cst_23 = arith.constant 0.000000e+00 : f32
      %32 = vector.broadcast %cst_23 : f32 to vector<4x256xf32>
      %c0_24 = arith.constant 0 : index
      %c0_25 = arith.constant 0 : index
      %33 = vector.load %arg6[%c0_24, %c0_25] : memref<4x256xf32, #tpu.memory_space<vmem>>, vector<4x256xf32>
      tpu.vector_store %arg6[%c0_24, %c0_25], %32 {strides = array<i32>} : memref<4x256xf32, #tpu.memory_space<vmem>>, vector<4x256xf32>,
      %cst_26 = arith.constant 0.000000e+00 : f32
      %34 = vector.broadcast %cst_26 : f32 to vector<4x256xf32>
      %c0_27 = arith.constant 0 : index
      %c0_28 = arith.constant 0 : index
      %35 = vector.load %arg7[%c0_27, %c0_28] : memref<4x256xf32, #tpu.memory_space<vmem>>, vector<4x256xf32>
      tpu.vector_store %arg7[%c0_27, %c0_28], %34 {strides = array<i32>} : memref<4x256xf32, #tpu.memory_space<vmem>>, vector<4x256xf32>,
    } else {
    }
    %c0 = arith.constant 0 : index
    %c0_3 = arith.constant 0 : index
    %c0_4 = arith.constant 0 : index
    %8 = vector.load %arg2[%c0, %c0_3, %c0_4] : memref<1x4x256xf32, #tpu.memory_space<vmem>>, vector<1x4x256xf32>
    %9 = vector.shape_cast %8 : vector<1x4x256xf32> to vector<4x256xf32>
    %c0_5 = arith.constant 0 : index
    %c0_6 = arith.constant 0 : index
    %c0_7 = arith.constant 0 : index
    %10 = vector.load %arg3[%c0_5, %c0_6, %c0_7] : memref<1x1x256xi32, #tpu.memory_space<vmem>>, vector<1x1x256xi32>
    %11 = vector.shape_cast %10 : vector<1x1x256xi32> to vector<1x256xi32>
    %12 = tpu.iota {dimensions = array<i32: 0>} : vector<4x256xi32>
    %13 = vector.broadcast %11 : vector<1x256xi32> to vector<4x256xi32>
    %14 = arith.cmpi eq, %12, %13 : vector<4x256xi32>
    %15 = arith.extui %14 : vector<4x256xi1> to vector<4x256xi32>
    %16 = arith.sitofp %15 : vector<4x256xi32> to vector<4x256xf32>
    %c0_8 = arith.constant 0 : index
    %c0_9 = arith.constant 0 : index
    %17 = vector.load %arg5[%c0_8, %c0_9] : memref<4x256xf32, #tpu.memory_space<vmem>>, vector<4x256xf32>
    %18 = arith.mulf %9, %16 : vector<4x256xf32>
    %19 = arith.addf %17, %18 : vector<4x256xf32>
    %c0_10 = arith.constant 0 : index
    %c0_11 = arith.constant 0 : index
    %20 = vector.load %arg5[%c0_10, %c0_11] : memref<4x256xf32, #tpu.memory_space<vmem>>, vector<4x256xf32>
    tpu.vector_store %arg5[%c0_10, %c0_11], %19 {strides = array<i32>} : memref<4x256xf32, #tpu.memory_space<vmem>>, vector<4x256xf32>,
    %c0_12 = arith.constant 0 : index
    %c0_13 = arith.constant 0 : index
    %21 = vector.load %arg6[%c0_12, %c0_13] : memref<4x256xf32, #tpu.memory_space<vmem>>, vector<4x256xf32>
    %22 = arith.addf %21, %16 : vector<4x256xf32>
    %c0_14 = arith.constant 0 : index
    %c0_15 = arith.constant 0 : index
    %23 = vector.load %arg6[%c0_14, %c0_15] : memref<4x256xf32, #tpu.memory_space<vmem>>, vector<4x256xf32>
    tpu.vector_store %arg6[%c0_14, %c0_15], %22 {strides = array<i32>} : memref<4x256xf32, #tpu.memory_space<vmem>>, vector<4x256xf32>,
    %c0_16 = arith.constant 0 : index
    %c0_17 = arith.constant 0 : index
    %24 = vector.load %arg7[%c0_16, %c0_17] : memref<4x256xf32, #tpu.memory_space<vmem>>, vector<4x256xf32>
    %25 = arith.mulf %9, %9 : vector<4x256xf32>
    %26 = arith.addf %24, %25 : vector<4x256xf32>
    %c0_18 = arith.constant 0 : index
    %c0_19 = arith.constant 0 : index
    %27 = vector.load %arg7[%c0_18, %c0_19] : memref<4x256xf32, #tpu.memory_space<vmem>>, vector<4x256xf32>
    tpu.vector_store %arg7[%c0_18, %c0_19], %26 {strides = array<i32>} : memref<4x256xf32, #tpu.memory_space<vmem>>, vector<4x256xf32>,
    %28 = arith.extui %5 : i1 to i32
    %c0_i32_20 = arith.constant 0 : i32
    %29 = arith.cmpi ne, %28, %c0_i32_20 : i32
    scf.if %29 {
      %c0_21 = arith.constant 0 : index
      %c0_22 = arith.constant 0 : index
      %30 = vector.load %arg5[%c0_21, %c0_22] : memref<4x256xf32, #tpu.memory_space<vmem>>, vector<4x256xf32>
      %cst = arith.constant dense<0.000000e+00> : vector<4xf32>
      %31 = vector.multi_reduction <add>, %30, %cst [1] : vector<4x256xf32> to vector<4xf32>
      %32 = vector.shape_cast %31 : vector<4xf32> to vector<4x1xf32>
      %c0_23 = arith.constant 0 : index
      %c0_24 = arith.constant 0 : index
      %33 = vector.load %arg6[%c0_23, %c0_24] : memref<4x256xf32, #tpu.memory_space<vmem>>, vector<4x256xf32>
      %cst_25 = arith.constant dense<0.000000e+00> : vector<4xf32>
      %34 = vector.multi_reduction <add>, %33, %cst_25 [1] : vector<4x256xf32> to vector<4xf32>
      %35 = vector.shape_cast %34 : vector<4xf32> to vector<4x1xf32>
      %c0_26 = arith.constant 0 : index
      %c0_27 = arith.constant 0 : index
      %36 = vector.load %arg7[%c0_26, %c0_27] : memref<4x256xf32, #tpu.memory_space<vmem>>, vector<4x256xf32>
      %cst_28 = arith.constant dense<0.000000e+00> : vector<4xf32>
      %37 = vector.multi_reduction <add>, %36, %cst_28 [1] : vector<4x256xf32> to vector<4xf32>
      %38 = vector.shape_cast %37 : vector<4xf32> to vector<4x1xf32>
      %cst_29 = arith.constant 2.000000e+00 : f32
      %39 = vector.broadcast %cst_29 : f32 to vector<4x1xf32>
      %40 = arith.mulf %39, %32 : vector<4x1xf32>
      %cst_30 = arith.constant 9.99999974E-6 : f32
      %41 = vector.broadcast %cst_30 : f32 to vector<4x1xf32>
      %42 = arith.addf %40, %41 : vector<4x1xf32>
      %43 = arith.addf %38, %35 : vector<4x1xf32>
      %cst_31 = arith.constant 9.99999974E-6 : f32
      %44 = vector.broadcast %cst_31 : f32 to vector<4x1xf32>
      %45 = arith.addf %43, %44 : vector<4x1xf32>
      %46 = arith.divf %42, %45 : vector<4x1xf32>
      %cst_32 = arith.constant 1.000000e+00 : f32
      %47 = vector.broadcast %cst_32 : f32 to vector<4x1xf32>
      %48 = arith.subf %47, %46 : vector<4x1xf32>
      %c0_33 = arith.constant 0 : index
      %c0_34 = arith.constant 0 : index
      %49 = vector.load %arg4[%c0_33, %c0_34] : memref<4x1xf32, #tpu.memory_space<vmem>>, vector<4x1xf32>
      tpu.vector_store %arg4[%c0_33, %c0_34], %48 {strides = array<i32>} : memref<4x1xf32, #tpu.memory_space<vmem>>, vector<4x1xf32>,
    } else {
    }
    return
  }
  func.func @transform_0(%arg0: i32, %arg1: i32) -> (i32, i32, i32) {
    %c0_i32 = arith.constant 0 : i32
    %c0_i32_0 = arith.constant 0 : i32
    return %arg0, %c0_i32, %arg1 : i32, i32, i32
  }
  func.func @transform_1(%arg0: i32, %arg1: i32) -> (i32, i32, i32) {
    %c0_i32 = arith.constant 0 : i32
    %c0_i32_0 = arith.constant 0 : i32
    return %arg0, %c0_i32, %arg1 : i32, i32, i32
  }
  func.func @transform_2(%arg0: i32, %arg1: i32) -> (i32, i32) {
    %c0_i32 = arith.constant 0 : i32
    %c0_i32_0 = arith.constant 0 : i32
    %c0_i32_1 = arith.constant 0 : i32
    return %c0_i32, %c0_i32_0 : i32, i32
  }
}

</mosaic_0001>

<bundles_post_ra>
// kernel: dice_loss.1
= control target key start
LH: loop header
LB: loop body
LE: loop exit
PB: predicated region body
PF: predicated region fallthrough
CT: control target
= control target key end

     0   :  { %s419_s9 = smov 0   ;;  %s421_s10 = smov 0   ;;  %s463_s0 = inlined_call_operand.vmem [shape: f32[2,4,256], index: 0, kind: input, shape index: {}]   ;;  %s464_s1 = inlined_call_operand.vmem [shape: s32[2,1,256], index: 1, kind: input, shape index: {}]   ;;  %s465_s2 = inlined_call_operand.vmem [shape: f32[4,1], index: 2, kind: output, shape index: {}]  }
   0x1   :  { %s423_s11 = smov 0  }
   0x2 LB: > { %s24_s12 = sadd.s32 1, %s396_s10  ;;  %p334_p0 = scmp.ge.s32.totalorder %s400_s11, 1  ;;  %s400_s11 = sphi %s423_s11, %s12_s11   ;;  %s396_s10 = sphi %s421_s10, %s467_s10   ;;  %s392_s9 = sphi %s419_s9, %s466_s9  }
   0x3   : > { %p26_p1 = scmp.ge.s32.totalorder %s24_s12, 2  ;;  %p142_p2 = scmp.lt.s32.totalorder %s400_s11, 3 }
   0x5   : > { %s469_s12 = smov (%p26_p1, %s24_s12), 0  ;;  %p143_p3 = pnand %p334_p0, %p142_p2 }
   0x6   : > { %p172_p4 = scmp.lt.s32.totalorder (!%p143_p3), %s392_s9, 1  ;;  %p190_p5 = scmp.eq.s32.totalorder (!%p143_p3), %s392_s9, 0 }
   0x7   : > { %146 = sbr.rel (%p143_p3) target bundleno = 215 (0xd7), region = 28  ;;  %p194_p6 = scmp.eq.s32.totalorder (!%p143_p3), %s392_s9, 1 }
   0xe   : > { %s173_s13 = scalar_select %p172_p4, %s392_s9, 1 }
   0xf   : > { %198 = sbr.rel (!%p190_p5) target bundleno = 22 (0x16), region = 32  ;;  %v402_v0 = vmov (%p190_p5), 0.0  }
  0x10   : > { %s344_s14 = sshll.u32 %s173_s13, 3  ;;  %s337_s15 = sshll.u32 %s173_s13, 1  ;;  %199 = vst [vmem:[#allocation2] sm:$0xff] (%p190_p5), %v402_v0  ;;  %200 = vst [vmem:[#allocation3] sm:$0xff] (%p190_p5), %v402_v0 }
  0x11   : > { %s179_s18 = scalar_lea.vmem %s463_s0, %s344_s14  ;;  %s188_s21 = scalar_lea.vmem %s464_s1, %s337_s15  ;;  %201 = vst [vmem:[#allocation4] sm:$0xff] (%p190_p5), %v402_v0 }
  0x16 PF: > { %v202_v1 = vld [vmem:[%s179_s18] sm:$0xff]  ;;  %v204_v2 = vlaneseq  ;;  %v403_v12 = vmov 0.0   ;;  %vm241_vm2 = vcmask (%p194_p6), 1043456   ;;  %vm272_vm3 = vcmask (%p194_p6), 3072  }
  0x17   : > { %v232_v4 = vmul.f32 %v202_v1, %v202_v1  ;;  %v203_v6 = vld [vmem:[%s188_s21] sm:$0x3]  ;;  %v228_v15 = vld [vmem:[#allocation3] sm:$0xff] }
  0x18   : > { %v231_v3 = vld [vmem:[#allocation4] sm:$0xff]  ;;  %v205_v5 = vshrl.u32 %v204_v2, 7  ;;  %v220_v17 = vld [vmem:[#allocation2] sm:$0xff] }
  0x19   : > { %v233_v7 = vadd.f32 %v232_v4, %v231_v3 }
  0x1a   : > { %v208_v8 = vsub.s32 0, %v205_v5  ;;  %v212_v9 = vsub.s32 1, %v205_v5 }
  0x1b   : > { %234 = vst [vmem:[#allocation4] sm:$0xff] %v233_v7 }
  0x1c   : > { %v209_v10 = vrot.slane %v203_v6, %v208_v8  ;;  %v213_v11 = vrot.slane %v203_v6, %v212_v9 }
  0x1e   : > { %vm214_vm0 = vcmp.eq.s32.totalorder %v205_v5, %v209_v10  ;;  %vm215_vm1 = vcmp.eq.s32.totalorder %v205_v5, %v213_v11 }
  0x1f   : > { %v340_v13 = vsel %vm214_vm0, 1.0, %v403_v12  ;;  %v341_v14 = vsel %vm215_vm1, 1.0, %v403_v12 }
  0x20   : > { %v223_v16 = vcombine.low %v340_v13, %v341_v14  ;;  %236 = sbr.rel (!%p194_p6) target bundleno = 215 (0xd7), region = 36 }
  0x22   : > { %v225_v18 = vmul.f32 %v223_v16, %v202_v1  ;;  %v229_v19 = vadd.f32 %v228_v15, %v223_v16  ;;  %v256_v22 = vld [vmem:[#allocation4] sm:$0xff] (%p194_p6) }
  0x23   : > { %v258_v26 = vcombine.high (%p194_p6), %v256_v22, %v256_v22  ;;  %v260_v30 = vsel (%p194_p6), %vm241_vm2, %v256_v22, 0.0 }
  0x24   : > { %v226_v20 = vadd.f32 %v225_v18, %v220_v17  ;;  %230 = vst [vmem:[#allocation3] sm:$0xff] %v229_v19 }
  0x25   : > { %v261_v31 = vsel (%p194_p6), %vm241_vm2, %v258_v26, 0.0 }
  0x26   : > { %227 = vst [vmem:[#allocation2] sm:$0xff] %v226_v20  ;;  %v262_v35 = vadd.f32 (%p194_p6), %v261_v31, %v260_v30 }
  0x2b   : > { %v247_v21 = vld [vmem:[#allocation3] sm:$0xff] }
  0x2c   : > { %v249_v24 = vcombine.high %v247_v21, %v247_v21  ;;  %v251_v25 = vsel %vm241_vm2, %v247_v21, 0.0 }
  0x2d   : > { %v237_v23 = vld [vmem:[#allocation2] sm:$0xff] }
  0x2e   : > { %v239_v27 = vcombine.high %v237_v23, %v237_v23  ;;  %v242_v28 = vsel %vm241_vm2, %v237_v23, 0.0  ;;  %v252_v29 = vsel %vm241_vm2, %v249_v24, 0.0 }
  0x2f   : > { %v253_v32 = vadd.f32 %v252_v29, %v251_v25 }
  0x30   : > { %v243_v33 = vsel %vm241_vm2, %v239_v27, 0.0 }
  0x31   : > { %v244_v34 = vadd.f32 %v243_v33, %v242_v28  ;;  %254 = vadd.xlane.f32.xlu0 %v253_v32 }
  0x33   : > { %245 = vadd.xlane.f32.xlu1 %v244_v34 }
  0x35   : > { %263 = vadd.xlane.f32.xlu0 %v262_v35 }
  0xbe   : > { %v255_v36 = vpop.xlane.xlu0 %254 }
  0xc0   : > { %v246_v40 = vpop.xlane.xlu1 %245 }
  0xc1   : > { %v265_v41 = vmul.f32 2.0, %v246_v40 }
  0xc2   : > { %v264_v37 = vpop.xlane.xlu0 %263 }
  0xc3   : > { %v267_v38 = vadd.f32 %v264_v37, %v255_v36  ;;  %v266_v42 = vadd.f32 1e-05, %v265_v41 }
  0xc5   : > { %v268_v39 = vadd.f32 1e-05, %v267_v38 }
  0xc7   : > { %376 = vrcp.f32 %v268_v39 }
  0xd1   : > { %v377_v43 = vpop.eup %376 }
  0xd2   : > { %v270_v44 = vmul.f32 %v377_v43, %v266_v42 }
  0xd4   : > { %v271_v45 = vsub.f32 1.0, %v270_v44 }
  0xd6   : > { %273 = vst.msk [vmem:[%s465_s2] sm:$0xf] %vm272_vm3, %v271_v45 }
  0xd7 PF: > { %s12_s11 = sadd.s32 1, %s400_s11   ;;  %s466_s9 = smov %s396_s10 }
  0xd8   : > { %p9_p7 = scmp.ge.s32.totalorder %s12_s11, 4   ;;  %s467_s10 = smov %s469_s12 }
  0xda   :  { %11 = sbr.rel (!%p9_p7) target bundleno = 2 (0x2), region = 65 }

</bundles_post_ra>
